<compile_context>
chip_gen: v6e
topology: v6e:2x2x1
jax: 0.10.0
libtpu: 0.0.40
codegen_flags: <defaults>
</compile_context>

<pallas_src>
import functools

import jax
import jax.numpy as jnp
from jax import lax
from jax.experimental import pallas as pl
from jax.experimental.pallas import tpu as pltpu


def _cdiv(a, b):
    return -(-a // b)


def _round_up(a, b):
    return _cdiv(a, b) * b


def _choose_tile_h(h_out, unit, row_bytes, fixed_bytes, budget_bytes):
    """Output-row tile height TH: a multiple of `unit` whose true per-step
    VMEM footprint (fixed + TH*row_bytes) fits the budget; prefers >=2 row
    tiles per image so the pipeline (and the second TensorCore on v7x) has
    independent grid steps to work on."""
    h_full = _round_up(h_out, unit)
    avail = max(budget_bytes - fixed_bytes, unit * row_bytes)
    th = max(unit, (avail // row_bytes) // unit * unit)
    if h_full > unit:
        th = min(th, _round_up(_cdiv(h_out, 2), unit))
    return int(min(th, h_full))


def _dilconv_kernel(x_main_ref, x_halo_ref, w_ref, o_ref, *,
                    k, dil, st, TH, W1, C, Cout):
    # x_main_ref: (TH*st, Wp, C)  input rows owned by this tile (pre-padded)
    # x_halo_ref: (Hh, Wp, C)     halo rows = start of the next tile's rows
    # w_ref     : (k, k, C, Cout) folded depthwise*pointwise weights
    # o_ref     : (TH, W1, Cout)  conv interior only (no zero border)
    win = jnp.concatenate([x_main_ref[...], x_halo_ref[...]], axis=0)
    w = w_ref[...]                                    # tiny, hoisted

    acc = jnp.zeros((TH * W1, Cout), jnp.float32)
    for ki in range(k):                               # static tap loops
        hs = ki * dil
        for kj in range(k):
            ws = kj * dil
            if st == 1:
                tap = win[hs:hs + TH, ws:ws + W1, :]
            else:
                tap = lax.slice(win, (hs, ws, 0),
                                (hs + (TH - 1) * st + 1,
                                 ws + (W1 - 1) * st + 1, C),
                                (st, st, 1))
            tap = jnp.maximum(tap, 0.0)               # fused ReLU (compute dtype)
            # depthwise tap folded into the pointwise weights -> MXU matmul,
            # f32 accumulation.
            acc = acc + jnp.dot(tap.reshape(TH * W1, C), w[ki, kj],
                                preferred_element_type=jnp.float32)
    o_ref[...] = acc.reshape(TH, W1, Cout).astype(o_ref.dtype)


def dilconv_forward(x_nchw, dw_weight, pw_weight, *,
                    kernel_size, stride, padding, dilation,
                    compute_dtype=jnp.bfloat16,
                    tile_budget_bytes=16 << 20,
                    vmem_limit_bytes=48 << 20):
    """x_nchw: (N, C_in, H, W); dw_weight: (C_in, 1, k, k);
    pw_weight: (C_out, C_in, 1, 1). Returns (N, C_out, H2, W2) like PyTorch.

    compute_dtype: dtype fed to the VPU/MXU inside the kernel (f32 accumulate
    either way). bfloat16 is the fast path on v6e/v7x; use float32 for
    bit-tighter results (and on v5e, whose VPU has no bf16). On v5e/v6e
    (128 MiB VMEM) tile_budget_bytes / vmem_limit_bytes can be raised further."""
    N, C, H, W = x_nchw.shape
    Cout = pw_weight.shape[0]
    k, st, p, d = kernel_size, stride, padding, dilation

    H1 = (H + 2 * p - d * (k - 1) - 1) // st + 1     # depthwise conv output
    W1 = (W + 2 * p - d * (k - 1) - 1) // st + 1
    Hp, Wp = H + 2 * p, W + 2 * p

    cdt = jnp.dtype(compute_dtype)
    odt = jnp.dtype(x_nchw.dtype)

    # Halo rows needed below each tile's own st*TH rows, padded to sublanes.
    halo_rows = max(d * (k - 1) + 1 - st, 0)
    Hh = max(8, _round_up(max(halo_rows, 1), 8))

    # Per-output-row VMEM: 2x-buffered main input block + in-kernel window
    # copy, live relu'd tap operand, f32 accumulator, 2x-buffered output block.
    row_bytes = (3 * st * Wp * C * cdt.itemsize
                 + 2 * W1 * C * cdt.itemsize
                 + W1 * Cout * 4
                 + 2 * W1 * Cout * odt.itemsize)
    fixed_bytes = (3 * Hh * Wp * C * cdt.itemsize
                   + 2 * k * k * C * Cout * cdt.itemsize
                   + (1 << 20))
    TH = _choose_tile_h(H1, Hh, row_bytes, fixed_bytes, tile_budget_bytes)
    nTH = _cdiv(H1, TH)
    H1_pad = nTH * TH
    RH = (TH * st) // Hh        # halo block-index stride (TH is a multiple of Hh)

    # Layout prep: NCHW -> NHWC (C on lanes) fused with the spatial zero pad
    # and the compute-dtype cast — one HBM pass, no per-tile halo copies.
    Hp_tot = max(Hp, nTH * TH * st + Hh)
    x_nhwc = jnp.transpose(x_nchw, (0, 2, 3, 1))
    x_sp = jnp.pad(x_nhwc, ((0, 0), (p, Hp_tot - H - p), (p, p), (0, 0)))
    x_sp = x_sp.astype(cdt)

    # Fold depthwise weights into per-tap pointwise weights: (k, k, C, Cout).
    w_fold = jnp.einsum('ckl,oc->klco', dw_weight[:, 0],
                        pw_weight[:, :, 0, 0]).astype(cdt)

    kernel = functools.partial(_dilconv_kernel, k=k, dil=d, st=st, TH=TH,
                               W1=W1, C=C, Cout=Cout)

    out = pl.pallas_call(
        kernel,
        out_shape=jax.ShapeDtypeStruct((N, H1_pad, W1, Cout), x_nchw.dtype),
        grid_spec=pltpu.PrefetchScalarGridSpec(
            num_scalar_prefetch=0,
            grid=(N, nTH),
            in_specs=[
                pl.BlockSpec((None, TH * st, Wp, C),
                             lambda n, t: (n, t, 0, 0)),
                pl.BlockSpec((None, Hh, Wp, C),
                             lambda n, t: (n, (t + 1) * RH, 0, 0)),
                pl.BlockSpec((k, k, C, Cout), lambda n, t: (0, 0, 0, 0)),
            ],
            out_specs=pl.BlockSpec((None, TH, W1, Cout),
                                   lambda n, t: (n, t, 0, 0)),
        ),
        compiler_params=pltpu.CompilerParams(
            dimension_semantics=("parallel", "parallel"),
            vmem_limit_bytes=vmem_limit_bytes),
    )(x_sp, x_sp, w_fold)

    out = out[:, :H1]                                # drop padded rows
    # zero border of width `padding` from the 1x1 conv's own zero padding
    out = jnp.pad(out, ((0, 0), (p, p), (p, p), (0, 0)))
    return jnp.transpose(out, (0, 3, 1, 2))          # back to NCHW


def dilconv_reference(x, dw_weight, pw_weight, *,
                      kernel_size, stride, padding, dilation):
    """Pure-JAX reference matching the PyTorch module."""
    C = x.shape[1]
    y = jnp.maximum(x, 0.0)
    y = lax.conv_general_dilated(
        y, dw_weight, window_strides=(stride, stride),
        padding=[(padding, padding), (padding, padding)],
        rhs_dilation=(dilation, dilation),
        feature_group_count=C,
        dimension_numbers=("NCHW", "OIHW", "NCHW"))
    y = lax.conv_general_dilated(
        y, pw_weight, window_strides=(1, 1),
        padding=[(padding, padding), (padding, padding)],
        dimension_numbers=("NCHW", "OIHW", "NCHW"))
    return y


def _run_case(key, *, N, C_in, C_out, H, W, k, st, p, d,
              compute_dtype, atol, rtol):
    kx, kd, kp = jax.random.split(key, 3)
    x = jax.random.normal(kx, (N, C_in, H, W), dtype=jnp.float32)
    dw_w = jax.random.normal(kd, (C_in, 1, k, k), dtype=jnp.float32) * 0.2
    pw_w = jax.random.normal(kp, (C_out, C_in, 1, 1), dtype=jnp.float32) * 0.2

    out = dilconv_forward(x, dw_w, pw_w, kernel_size=k, stride=st,
                          padding=p, dilation=d, compute_dtype=compute_dtype)
    out = jax.block_until_ready(out)

    ref = dilconv_reference(x, dw_w, pw_w, kernel_size=k, stride=st,
                            padding=p, dilation=d)
    assert out.shape == ref.shape, (out.shape, ref.shape)
    err = float(jnp.max(jnp.abs(out - ref)))
    assert jnp.allclose(out, ref, atol=atol, rtol=rtol), (
        "mismatch vs reference", err)


if __name__ == "__main__":
    key = jax.random.PRNGKey(0)
    k1, k2 = jax.random.split(key)

    # DilConv(in=4, out=8, kernel=3, stride=1, padding=2, dilation=2),
    # exact float32 compute path (tight tolerance).
    _run_case(k1, N=2, C_in=4, C_out=8, H=16, W=16, k=3, st=1, p=2, d=2,
              compute_dtype=jnp.float32, atol=1e-4, rtol=1e-4)

    # Same config on the fast bf16 MXU-feed path (f32 accumulation).
    _run_case(k1, N=2, C_in=4, C_out=8, H=16, W=16, k=3, st=1, p=2, d=2,
              compute_dtype=jnp.bfloat16, atol=2e-2, rtol=2e-2)

    # Taller / non-divisible H1: exercises the multi-row-tile grid, the halo
    # blocks, and output-row trimming.
    _run_case(k2, N=1, C_in=8, C_out=16, H=20, W=16, k=3, st=1, p=2, d=2,
              compute_dtype=jnp.bfloat16, atol=2e-2, rtol=2e-2)

    print("KERNEL_OK")
</pallas_src>

<mosaic_0001>
module attributes {stable_mosaic.version = 11 : i64} {
  func.func @_dilconv_kernel(%arg0: i32, %arg1: i32, %arg2: memref<1x8x20x4xf32, #tpu.memory_space<vmem>>, %arg3: memref<1x8x20x4xf32, #tpu.memory_space<vmem>>, %arg4: memref<3x3x4x8xf32, #tpu.memory_space<vmem>>, %arg5: memref<1x8x16x8xf32, #tpu.memory_space<vmem>>) attributes {dimension_semantics = [#tpu.dimension_semantics<parallel>, #tpu.dimension_semantics<parallel>], iteration_bounds = array<i64: 2, 2>, scalar_prefetch = 0 : i64, scratch_operands = 0 : i64, tpu.core_type = #tpu.core_type<tc>, window_params = [{transform_indices = @transform_0, window_bounds = array<i64: 1, 8, 20, 4>}, {transform_indices = @transform_1, window_bounds = array<i64: 1, 8, 20, 4>}, {pipeline_mode = #tpu.pipeline_mode<synchronous>, transform_indices = @transform_2, window_bounds = array<i64: 3, 3, 4, 8>}, {transform_indices = @transform_3, window_bounds = array<i64: 1, 8, 16, 8>}]} {
    %c0 = arith.constant 0 : index
    %c0_0 = arith.constant 0 : index
    %c0_1 = arith.constant 0 : index
    %c0_2 = arith.constant 0 : index
    %0 = vector.load %arg2[%c0, %c0_0, %c0_1, %c0_2] : memref<1x8x20x4xf32, #tpu.memory_space<vmem>>, vector<1x8x20x4xf32>
    %1 = vector.shape_cast %0 : vector<1x8x20x4xf32> to vector<8x20x4xf32>
    %c0_3 = arith.constant 0 : index
    %c0_4 = arith.constant 0 : index
    %c0_5 = arith.constant 0 : index
    %c0_6 = arith.constant 0 : index
    %2 = vector.load %arg3[%c0_3, %c0_4, %c0_5, %c0_6] : memref<1x8x20x4xf32, #tpu.memory_space<vmem>>, vector<1x8x20x4xf32>
    %3 = vector.shape_cast %2 : vector<1x8x20x4xf32> to vector<8x20x4xf32>
    %4 = tpu.concatenate %1, %3 in 0 : vector<8x20x4xf32>, vector<8x20x4xf32> -> vector<16x20x4xf32>
    %c0_7 = arith.constant 0 : index
    %c0_8 = arith.constant 0 : index
    %c0_9 = arith.constant 0 : index
    %c0_10 = arith.constant 0 : index
    %5 = vector.load %arg4[%c0_7, %c0_8, %c0_9, %c0_10] : memref<3x3x4x8xf32, #tpu.memory_space<vmem>>, vector<3x3x4x8xf32>
    %cst = arith.constant 0.000000e+00 : f32
    %6 = vector.broadcast %cst : f32 to vector<128x8xf32>
    %7 = vector.extract_strided_slice %4 {offsets = [0, 0, 0], sizes = [8, 16, 4], strides = [1, 1, 1]} : vector<16x20x4xf32> to vector<8x16x4xf32>
    %cst_11 = arith.constant 0.000000e+00 : f32
    %8 = vector.broadcast %cst_11 : f32 to vector<8x16x4xf32>
    %9 = arith.maximumf %7, %8 : vector<8x16x4xf32>
    %10 = vector.shape_cast %9 : vector<8x16x4xf32> to vector<128x4xf32>
    %11 = vector.extract_strided_slice %5 {offsets = [0, 0, 0, 0], sizes = [1, 1, 4, 8], strides = [1, 1, 1, 1]} : vector<3x3x4x8xf32> to vector<1x1x4x8xf32>
    %12 = vector.shape_cast %11 : vector<1x1x4x8xf32> to vector<4x8xf32>
    %cst_12 = arith.constant dense<0.000000e+00> : vector<128x8xf32>
    %13 = tpu.matmul %10, %12, %cst_12 {dimension_numbers = #tpu.dot_dimension_numbers<[1], [0], [0], [1], [0, 0, 1, 1], [], []>} : vector<128x4xf32>, vector<4x8xf32>, vector<128x8xf32> -> vector<128x8xf32>
    %14 = arith.addf %6, %13 : vector<128x8xf32>
    %15 = vector.extract_strided_slice %4 {offsets = [0, 2, 0], sizes = [8, 16, 4], strides = [1, 1, 1]} : vector<16x20x4xf32> to vector<8x16x4xf32>
    %cst_13 = arith.constant 0.000000e+00 : f32
    %16 = vector.broadcast %cst_13 : f32 to vector<8x16x4xf32>
    %17 = arith.maximumf %15, %16 : vector<8x16x4xf32>
    %18 = vector.shape_cast %17 : vector<8x16x4xf32> to vector<128x4xf32>
    %19 = vector.extract_strided_slice %5 {offsets = [0, 1, 0, 0], sizes = [1, 1, 4, 8], strides = [1, 1, 1, 1]} : vector<3x3x4x8xf32> to vector<1x1x4x8xf32>
    %20 = vector.shape_cast %19 : vector<1x1x4x8xf32> to vector<4x8xf32>
    %cst_14 = arith.constant dense<0.000000e+00> : vector<128x8xf32>
    %21 = tpu.matmul %18, %20, %cst_14 {dimension_numbers = #tpu.dot_dimension_numbers<[1], [0], [0], [1], [0, 0, 1, 1], [], []>} : vector<128x4xf32>, vector<4x8xf32>, vector<128x8xf32> -> vector<128x8xf32>
    %22 = arith.addf %14, %21 : vector<128x8xf32>
    %23 = vector.extract_strided_slice %4 {offsets = [0, 4, 0], sizes = [8, 16, 4], strides = [1, 1, 1]} : vector<16x20x4xf32> to vector<8x16x4xf32>
    %cst_15 = arith.constant 0.000000e+00 : f32
    %24 = vector.broadcast %cst_15 : f32 to vector<8x16x4xf32>
    %25 = arith.maximumf %23, %24 : vector<8x16x4xf32>
    %26 = vector.shape_cast %25 : vector<8x16x4xf32> to vector<128x4xf32>
    %27 = vector.extract_strided_slice %5 {offsets = [0, 2, 0, 0], sizes = [1, 1, 4, 8], strides = [1, 1, 1, 1]} : vector<3x3x4x8xf32> to vector<1x1x4x8xf32>
    %28 = vector.shape_cast %27 : vector<1x1x4x8xf32> to vector<4x8xf32>
    %cst_16 = arith.constant dense<0.000000e+00> : vector<128x8xf32>
    %29 = tpu.matmul %26, %28, %cst_16 {dimension_numbers = #tpu.dot_dimension_numbers<[1], [0], [0], [1], [0, 0, 1, 1], [], []>} : vector<128x4xf32>, vector<4x8xf32>, vector<128x8xf32> -> vector<128x8xf32>
    %30 = arith.addf %22, %29 : vector<128x8xf32>
    %31 = vector.extract_strided_slice %4 {offsets = [2, 0, 0], sizes = [8, 16, 4], strides = [1, 1, 1]} : vector<16x20x4xf32> to vector<8x16x4xf32>
    %cst_17 = arith.constant 0.000000e+00 : f32
    %32 = vector.broadcast %cst_17 : f32 to vector<8x16x4xf32>
    %33 = arith.maximumf %31, %32 : vector<8x16x4xf32>
    %34 = vector.shape_cast %33 : vector<8x16x4xf32> to vector<128x4xf32>
    %35 = vector.extract_strided_slice %5 {offsets = [1, 0, 0, 0], sizes = [1, 1, 4, 8], strides = [1, 1, 1, 1]} : vector<3x3x4x8xf32> to vector<1x1x4x8xf32>
    %36 = vector.shape_cast %35 : vector<1x1x4x8xf32> to vector<4x8xf32>
    %cst_18 = arith.constant dense<0.000000e+00> : vector<128x8xf32>
    %37 = tpu.matmul %34, %36, %cst_18 {dimension_numbers = #tpu.dot_dimension_numbers<[1], [0], [0], [1], [0, 0, 1, 1], [], []>} : vector<128x4xf32>, vector<4x8xf32>, vector<128x8xf32> -> vector<128x8xf32>
    %38 = arith.addf %30, %37 : vector<128x8xf32>
    %39 = vector.extract_strided_slice %4 {offsets = [2, 2, 0], sizes = [8, 16, 4], strides = [1, 1, 1]} : vector<16x20x4xf32> to vector<8x16x4xf32>
    %cst_19 = arith.constant 0.000000e+00 : f32
    %40 = vector.broadcast %cst_19 : f32 to vector<8x16x4xf32>
    %41 = arith.maximumf %39, %40 : vector<8x16x4xf32>
    %42 = vector.shape_cast %41 : vector<8x16x4xf32> to vector<128x4xf32>
    %43 = vector.extract_strided_slice %5 {offsets = [1, 1, 0, 0], sizes = [1, 1, 4, 8], strides = [1, 1, 1, 1]} : vector<3x3x4x8xf32> to vector<1x1x4x8xf32>
    %44 = vector.shape_cast %43 : vector<1x1x4x8xf32> to vector<4x8xf32>
    %cst_20 = arith.constant dense<0.000000e+00> : vector<128x8xf32>
    %45 = tpu.matmul %42, %44, %cst_20 {dimension_numbers = #tpu.dot_dimension_numbers<[1], [0], [0], [1], [0, 0, 1, 1], [], []>} : vector<128x4xf32>, vector<4x8xf32>, vector<128x8xf32> -> vector<128x8xf32>
    %46 = arith.addf %38, %45 : vector<128x8xf32>
    %47 = vector.extract_strided_slice %4 {offsets = [2, 4, 0], sizes = [8, 16, 4], strides = [1, 1, 1]} : vector<16x20x4xf32> to vector<8x16x4xf32>
    %cst_21 = arith.constant 0.000000e+00 : f32
    %48 = vector.broadcast %cst_21 : f32 to vector<8x16x4xf32>
    %49 = arith.maximumf %47, %48 : vector<8x16x4xf32>
    %50 = vector.shape_cast %49 : vector<8x16x4xf32> to vector<128x4xf32>
    %51 = vector.extract_strided_slice %5 {offsets = [1, 2, 0, 0], sizes = [1, 1, 4, 8], strides = [1, 1, 1, 1]} : vector<3x3x4x8xf32> to vector<1x1x4x8xf32>
    %52 = vector.shape_cast %51 : vector<1x1x4x8xf32> to vector<4x8xf32>
    %cst_22 = arith.constant dense<0.000000e+00> : vector<128x8xf32>
    %53 = tpu.matmul %50, %52, %cst_22 {dimension_numbers = #tpu.dot_dimension_numbers<[1], [0], [0], [1], [0, 0, 1, 1], [], []>} : vector<128x4xf32>, vector<4x8xf32>, vector<128x8xf32> -> vector<128x8xf32>
    %54 = arith.addf %46, %53 : vector<128x8xf32>
    %55 = vector.extract_strided_slice %4 {offsets = [4, 0, 0], sizes = [8, 16, 4], strides = [1, 1, 1]} : vector<16x20x4xf32> to vector<8x16x4xf32>
    %cst_23 = arith.constant 0.000000e+00 : f32
    %56 = vector.broadcast %cst_23 : f32 to vector<8x16x4xf32>
    %57 = arith.maximumf %55, %56 : vector<8x16x4xf32>
    %58 = vector.shape_cast %57 : vector<8x16x4xf32> to vector<128x4xf32>
    %59 = vector.extract_strided_slice %5 {offsets = [2, 0, 0, 0], sizes = [1, 1, 4, 8], strides = [1, 1, 1, 1]} : vector<3x3x4x8xf32> to vector<1x1x4x8xf32>
    %60 = vector.shape_cast %59 : vector<1x1x4x8xf32> to vector<4x8xf32>
    %cst_24 = arith.constant dense<0.000000e+00> : vector<128x8xf32>
    %61 = tpu.matmul %58, %60, %cst_24 {dimension_numbers = #tpu.dot_dimension_numbers<[1], [0], [0], [1], [0, 0, 1, 1], [], []>} : vector<128x4xf32>, vector<4x8xf32>, vector<128x8xf32> -> vector<128x8xf32>
    %62 = arith.addf %54, %61 : vector<128x8xf32>
    %63 = vector.extract_strided_slice %4 {offsets = [4, 2, 0], sizes = [8, 16, 4], strides = [1, 1, 1]} : vector<16x20x4xf32> to vector<8x16x4xf32>
    %cst_25 = arith.constant 0.000000e+00 : f32
    %64 = vector.broadcast %cst_25 : f32 to vector<8x16x4xf32>
    %65 = arith.maximumf %63, %64 : vector<8x16x4xf32>
    %66 = vector.shape_cast %65 : vector<8x16x4xf32> to vector<128x4xf32>
    %67 = vector.extract_strided_slice %5 {offsets = [2, 1, 0, 0], sizes = [1, 1, 4, 8], strides = [1, 1, 1, 1]} : vector<3x3x4x8xf32> to vector<1x1x4x8xf32>
    %68 = vector.shape_cast %67 : vector<1x1x4x8xf32> to vector<4x8xf32>
    %cst_26 = arith.constant dense<0.000000e+00> : vector<128x8xf32>
    %69 = tpu.matmul %66, %68, %cst_26 {dimension_numbers = #tpu.dot_dimension_numbers<[1], [0], [0], [1], [0, 0, 1, 1], [], []>} : vector<128x4xf32>, vector<4x8xf32>, vector<128x8xf32> -> vector<128x8xf32>
    %70 = arith.addf %62, %69 : vector<128x8xf32>
    %71 = vector.extract_strided_slice %4 {offsets = [4, 4, 0], sizes = [8, 16, 4], strides = [1, 1, 1]} : vector<16x20x4xf32> to vector<8x16x4xf32>
    %cst_27 = arith.constant 0.000000e+00 : f32
    %72 = vector.broadcast %cst_27 : f32 to vector<8x16x4xf32>
    %73 = arith.maximumf %71, %72 : vector<8x16x4xf32>
    %74 = vector.shape_cast %73 : vector<8x16x4xf32> to vector<128x4xf32>
    %75 = vector.extract_strided_slice %5 {offsets = [2, 2, 0, 0], sizes = [1, 1, 4, 8], strides = [1, 1, 1, 1]} : vector<3x3x4x8xf32> to vector<1x1x4x8xf32>
    %76 = vector.shape_cast %75 : vector<1x1x4x8xf32> to vector<4x8xf32>
    %cst_28 = arith.constant dense<0.000000e+00> : vector<128x8xf32>
    %77 = tpu.matmul %74, %76, %cst_28 {dimension_numbers = #tpu.dot_dimension_numbers<[1], [0], [0], [1], [0, 0, 1, 1], [], []>} : vector<128x4xf32>, vector<4x8xf32>, vector<128x8xf32> -> vector<128x8xf32>
    %78 = arith.addf %70, %77 : vector<128x8xf32>
    %79 = vector.shape_cast %78 : vector<128x8xf32> to vector<8x16x8xf32>
    %c0_29 = arith.constant 0 : index
    %c0_30 = arith.constant 0 : index
    %c0_31 = arith.constant 0 : index
    %c0_32 = arith.constant 0 : index
    %80 = vector.load %arg5[%c0_29, %c0_30, %c0_31, %c0_32] : memref<1x8x16x8xf32, #tpu.memory_space<vmem>>, vector<1x8x16x8xf32>
    %81 = vector.shape_cast %80 : vector<1x8x16x8xf32> to vector<8x16x8xf32>
    %82 = vector.shape_cast %79 : vector<8x16x8xf32> to vector<1x8x16x8xf32>
    tpu.vector_store %arg5[%c0_29, %c0_30, %c0_31, %c0_32], %82 {strides = array<i32>} : memref<1x8x16x8xf32, #tpu.memory_space<vmem>>, vector<1x8x16x8xf32>,
    return
  }
  func.func @transform_0(%arg0: i32, %arg1: i32) -> (i32, i32, i32, i32) {
    %c0_i32 = arith.constant 0 : i32
    %c0_i32_0 = arith.constant 0 : i32
    %c0_i32_1 = arith.constant 0 : i32
    return %arg0, %arg1, %c0_i32, %c0_i32_0 : i32, i32, i32, i32
  }
  func.func @transform_1(%arg0: i32, %arg1: i32) -> (i32, i32, i32, i32) {
    %c1_i32 = arith.constant 1 : i32
    %0 = arith.addi %arg1, %c1_i32 : i32
    %c1_i32_0 = arith.constant 1 : i32
    %1 = arith.muli %0, %c1_i32_0 : i32
    %c0_i32 = arith.constant 0 : i32
    %c0_i32_1 = arith.constant 0 : i32
    %c0_i32_2 = arith.constant 0 : i32
    return %arg0, %1, %c0_i32, %c0_i32_1 : i32, i32, i32, i32
  }
  func.func @transform_2(%arg0: i32, %arg1: i32) -> (i32, i32, i32, i32) {
    %c0_i32 = arith.constant 0 : i32
    %c0_i32_0 = arith.constant 0 : i32
    %c0_i32_1 = arith.constant 0 : i32
    %c0_i32_2 = arith.constant 0 : i32
    %c0_i32_3 = arith.constant 0 : i32
    return %c0_i32, %c0_i32_0, %c0_i32_1, %c0_i32_2 : i32, i32, i32, i32
  }
  func.func @transform_3(%arg0: i32, %arg1: i32) -> (i32, i32, i32, i32) {
    %c0_i32 = arith.constant 0 : i32
    %c0_i32_0 = arith.constant 0 : i32
    %c0_i32_1 = arith.constant 0 : i32
    return %arg0, %arg1, %c0_i32, %c0_i32_0 : i32, i32, i32, i32
  }
}

</mosaic_0001>

<bundles_post_ra>
// kernel: tpu_custom_call.1
= control target key start
LH: loop header
LB: loop body
LE: loop exit
PB: predicated region body
PF: predicated region fallthrough
CT: control target
= control target key end

     0   :  { %s2888_s12 = smov 0   ;;  %s2890_s13 = smov 0   ;;  %s3874_s0 = inlined_call_operand.vmem [shape: f32[2,24,20,4], index: 0, kind: input, shape index: {}]   ;;  %s3875_s1 = inlined_call_operand.vmem [shape: f32[2,24,20,4], index: 1, kind: input, shape index: {}]   ;;  %s3876_s2 = inlined_call_operand.vmem [shape: f32[3,3,4,8], index: 2, kind: input, shape index: {}]   ;;  %s3877_s3 = inlined_call_operand.vmem [shape: f32[2,16,16,8], index: 3, kind: output, shape index: {}]  }
   0x1   :  { %s2892_s14 = smov 0   ;;  %s2894_s15 = smov 0  }
   0x2   :  { %s2896_s16 = smov 0  }
   0x3 LB: > { %s22_s17 = sadd.s32 1, %s2858_s14  ;;  %s25_s18 = sadd.s32 1, %s2862_s15  ;;  %s2866_s16 = sphi %s2896_s16, %s13_s16   ;;  %s2862_s15 = sphi %s2894_s15, %s3943_s15   ;;  %s2858_s14 = sphi %s2892_s14, %s3942_s14   ;;  %s2854_s13 = sphi %s2890_s13, %s3941_s13   ;;  %s2850_s12 = sphi %s2888_s12, %s3940_s12  }
   0x4   : > { %p23_p0 = scmp.ge.s32.totalorder %s22_s17, 2  ;;  %p2230_p1 = scmp.ge.s32.totalorder %s2866_s16, 1 }
   0x5   : > { %p181_p2 = scmp.lt.s32.totalorder %s2866_s16, 5 }
   0x6   : > { %s3945_s17 = smov (%p23_p0, %s22_s17), 0  ;;  %s3947_s18 = smov (!%p23_p0, %s25_s18), %s2862_s15 }
   0x7   : > { %p182_p3 = pnand %p2230_p1, %p181_p2  ;;  %p27_p4 = scmp.ge.s32.totalorder %s3947_s18, 2 }
   0x9   : > { %s3949_s18 = smov (%p27_p4, %s3947_s18), 0  ;;  %185 = sbr.rel (%p182_p3) target bundleno = 373 (0x175), region = 32 }
   0xe   : > { %v298_v0 = vld [vmem:[%s3876_s2 + $0x4] sm:$0xf]  ;;  %vm428_vm0 = vcmask 1043456   ;;  %s2921_s21 = sshll.u32 %s2850_s12, 3  ;;  %p227_p5 = scmp.lt.s32.totalorder %s2854_s13, 1  ;;  %vm354_vm1 = vcmask 1045504  }
   0xf   : > { %2783 = vmatprep.subr.msk.mxu1 %vm428_vm0, %v298_v0  ;;  %2549 = vmatprep.subr.msk.mxu0 %vm428_vm0, %v298_v0  ;;  %p229_p6 = scmp.lt.s32.totalorder %s2921_s21, 23  ;;  %v2929_v1 = vld [vmem:[%s3876_s2] sm:$0xf]  ;;  %v2934_v2 = vld [vmem:[%s3876_s2 + $0x8] sm:$0xf]  ;;  %s2395_s30 = sadd.s32 8, %s2921_s21 }
  0x10   : > { %2784 = vmatpush3.msk.msra.mxu1 %vm428_vm0, %v298_v0  ;;  %2550 = vmatpush3.msk.msra.mxu0 %vm428_vm0, %v298_v0  ;;  %s3951_s13 = smov (!%p227_p5, %s2854_s13), 1  ;;  %vm395_vm2 = vcmask 31744   ;;  %p2959_p7 = scmp.lt.s32.totalorder %s2395_s30, 23  ;;  %v2998_v26 = vld [vmem:[%s3876_s2 + $0x10] sm:$0xf]  ;;  %vm2089_vm3 = vcmask 64512  }
  0x11   : > { %s230_s26 = scalar_select %p229_p6, %s2921_s21, 23  ;;  %2575 = vmatprep.subr.msk.mxu1 %vm428_vm0, %v2929_v1  ;;  %2601 = vmatprep.subr.msk.mxu0 %vm428_vm0, %v2934_v2  ;;  %v3040_v44 = vld [vmem:[%s3876_s2 + $0xc] sm:$0xf] }
  0x12   : > { %s2786_s27 = smul.u32 72, %s3951_s13  ;;  %s3953_s30 = smov (!%p2959_p7, %s2395_s30), 23 }
  0x13   : > { %s2785_s28 = smul.u32 3, %s230_s26  ;;  %p253_p8 = scmp.lt.s32.totalorder %s2921_s21, 15 }
  0x14   : > { %s2787_s19 = smul.u32 3, %s3953_s30  ;;  %s2237_s8 = sshll.u32 %s3951_s13, 5 }
  0x15   : > { %s233_s29 = sadd.s32 %s2786_s27, %s2785_s28  ;;  %s3955_s21 = smov (!%p253_p8, %s2921_s21), 15 }
  0x16   : > { %s2232_s4 = sshll.u32 %s233_s29, 3  ;;  %s245_s20 = sadd.s32 %s2787_s19, %s2786_s27 }
  0x17   : > { %s2952_s7 = scalar_lea.vmem %s3874_s0, %s2232_s4  ;;  %s2234_s22 = sshll.u32 %s245_s20, 3 }
  0x18   : > { %v261_v3 = vld [vmem:[%s2952_s7] sm:$0xff]  ;;  %v262_v4 = vld [vmem:[%s2952_s7 + $0x8] sm:$0xff]  ;;  %v2971_v10 = vld [vmem:[%s2952_s7 + $0x10] sm:$0xf]  ;;  %s3171_s25 = scalar_lea.vmem %s3875_s1, %s2234_s22 }
  0x19   : > { %v273_v5 = vld [vmem:[%s2952_s7 + $0x60] sm:$0xff]  ;;  %v2963_v6 = vmax.f32 %v261_v3, 0.0  ;;  %v2965_v7 = vmax.f32 %v262_v4, 0.0  ;;  %v274_v8 = vld [vmem:[%s2952_s7 + $0x68] sm:$0xff]  ;;  %v322_v12 = vmax.f32 %v2971_v10, 0.0  ;;  %v264_v14 = vld [vmem:[%s2952_s7 + $0x18] sm:$0xff] }
  0x1a   : > { %v2968_v9 = vmax.f32 %v273_v5, 0.0  ;;  %v2973_v11 = vmax.f32 %v274_v8, 0.0  ;;  %v2977_v13 = vld [vmem:[%s2952_s7 + $0x70] sm:$0xf]  ;;  %v265_v15 = vld [vmem:[%s2952_s7 + $0x20] sm:$0xff]  ;;  %v276_v20 = vld [vmem:[%s2952_s7 + $0x78] sm:$0xff] }
  0x1b   : > { %v355_v16 = vrot.slane %v2963_v6, 2  ;;  %v356_v17 = vrot.slane %v2965_v7, 2  ;;  %v326_v19 = vmax.f32 %v2977_v13, 0.0  ;;  %v277_v21 = vld [vmem:[%s2952_s7 + $0x80] sm:$0xff]  ;;  %v358_v23 = vrot.slane %v322_v12, 2  ;;  %v267_v32 = vld [vmem:[%s2952_s7 + $0x30] sm:$0xff] }
  0x1c   : > { %v375_v18 = vrot.slane %v2968_v9, 2  ;;  %v376_v22 = vrot.slane %v2973_v11, 2  ;;  %v2990_v24 = vmax.f32 %v264_v14, 0.0  ;;  %v2993_v25 = vld [vmem:[%s2952_s7 + $0x28] sm:$0xf]  ;;  %v3003_v29 = vmax.f32 %v265_v15, 0.0 }
  0x1d   : > { %v357_v27 = vsel %vm354_vm1, %v355_v16, %v356_v17  ;;  %v378_v28 = vrot.slane %v326_v19, 2  ;;  %v3005_v30 = vmax.f32 %v276_v20, 0.0  ;;  %v3008_v31 = vld [vmem:[%s2952_s7 + $0x88] sm:$0xf]  ;;  %v359_v34 = vsel %vm354_vm1, %v356_v17, %v358_v23  ;;  %v268_v37 = vld [vmem:[%s2952_s7 + $0x38] sm:$0xff]  ;;  %v279_v38 = vld [vmem:[%s2952_s7 + $0x90] sm:$0xff] }
  0x1e   : > { %2551 = vmatprep.mubr.msk.f32.mxu0 %vm395_vm2, %v357_v27  ;;  %v3013_v33 = vsel %vm354_vm1, %v375_v18, %v376_v22  ;;  %v360_v35 = vrot.slane %v2990_v24, 2  ;;  %v3017_v36 = vmax.f32 %v277_v21, 0.0  ;;  %v280_v39 = vld [vmem:[%s2952_s7 + $0x98] sm:$0xff]  ;;  %v361_v41 = vrot.slane %v3003_v29, 2  ;;  %v3053_v49 = vld [vmem:[%s2952_s7 + $0x40] sm:$0xf] }
  0x1f   : > { %2563 = vmatprep.mubr.msk.f32.mxu1 %vm395_vm2, %v3013_v33  ;;  %2552 = vmatmul.mubr.msk.f32.vlgmr.msra.gmra.mxu0 %vm395_vm2, %v359_v34  ;;  %v3032_v40 = vsel %vm354_vm1, %v376_v22, %v378_v28  ;;  %v380_v42 = vrot.slane %v3005_v30, 2  ;;  %v323_v43 = vmax.f32 %v2993_v25, 0.0  ;;  %v327_v46 = vmax.f32 %v3008_v31, 0.0  ;;  %v3065_v54 = vld [vmem:[%s2952_s7 + $0xa0] sm:$0xf]  ;;  %v270_v55 = vld [vmem:[%s2952_s7 + $0x48] sm:$0xff] }
  0x20   : > { %2564 = vmatmul.mubr.msk.f32.vlgmr.msra.gmra.mxu1 %vm395_vm2, %v3032_v40  ;;  %2602 = vmatpush3.msk.msra.mxu0 %vm428_vm0, %v2934_v2  ;;  %v381_v45 = vrot.slane %v3017_v36, 2  ;;  %v3048_v47 = vmax.f32 %v267_v32, 0.0  ;;  %v3050_v48 = vmax.f32 %v268_v37, 0.0  ;;  %v362_v50 = vsel %vm354_vm1, %v360_v35, %v361_v41  ;;  %v271_v60 = vld [vmem:[%s2952_s7 + $0x50] sm:$0xff]  ;;  %v282_v61 = vld [vmem:[%s2952_s7 + $0xa8] sm:$0xff] }
  0x21   : > { %2576 = vmatpush3.msk.msra.mxu1 %vm428_vm0, %v2929_v1  ;;  %v363_v51 = vrot.slane %v323_v43, 2  ;;  %v3060_v52 = vmax.f32 %v279_v38, 0.0  ;;  %v3062_v53 = vmax.f32 %v280_v39, 0.0  ;;  %2653 = vmatprep.subr.msk.mxu0 %vm428_vm0, %v2998_v26  ;;  %v383_v57 = vrot.slane %v327_v46, 2  ;;  %v283_v2 = vld [vmem:[%s2952_s7 + $0xb0] sm:$0xff] }
  0x22   : > { %2554 = vmatprep.mubr.msk.f32.mxu0 %vm395_vm2, %v362_v50  ;;  %v3072_v56 = vsel %vm354_vm1, %v380_v42, %v381_v45  ;;  %v365_v58 = vrot.slane %v3048_v47, 2  ;;  %v366_v59 = vrot.slane %v3050_v48, 2  ;;  %2627 = vmatprep.subr.msk.mxu1 %vm428_vm0, %v3040_v44  ;;  %v324_v1 = vmax.f32 %v3053_v49, 0.0  ;;  %v3091_v3 = vld [vmem:[%s2952_s7 + $0x58] sm:$0xf] }
  0x23   : > { %2566 = vmatprep.mubr.msk.f32.mxu1 %vm395_vm2, %v3072_v56  ;;  %v364_v62 = vsel %vm354_vm1, %v361_v41, %v363_v51  ;;  %v385_v63 = vrot.slane %v3060_v52, 2  ;;  %v386_v0 = vrot.slane %v3062_v53, 2  ;;  %v3095_v4 = vsel %vm354_vm1, %v381_v45, %v383_v57  ;;  %v3104_v15 = vld [vmem:[%s2952_s7 + $0xb8] sm:$0xf]  ;;  %v3189_v25 = vld [vmem:[%s3876_s2 + $0x14] sm:$0xf] }
  0x24   : > { %2555 = vmatmul.mubr.msk.f32.gmra.mxu0 %vm395_vm2, %v364_v62  ;;  %v3098_v5 = vsel %vm354_vm1, %v365_v58, %v366_v59  ;;  %v3881_v8 = vmax.f32 %v3065_v54, 0.0  ;;  %v3101_v14 = vmax.f32 %v270_v55, 0.0  ;;  %2567 = vmatmul.mubr.msk.f32.gmra.mxu1 %vm395_vm2, %v3095_v4  ;;  %v368_v17 = vrot.slane %v324_v1, 2  ;;  %s2236_s7 = sshll.u32 %s3955_s21, 1 }
  0x25   : > { %2557 = vmatprep.mubr.msk.f32.mxu0 %vm395_vm2, %v3098_v5  ;;  %v3111_v16 = vsel %vm354_vm1, %v385_v63, %v386_v0  ;;  %v3113_v18 = vmax.f32 %v271_v60, 0.0  ;;  %v3115_v20 = vmax.f32 %v282_v61, 0.0  ;;  %v3122_v23 = vmax.f32 %v283_v2, 0.0  ;;  %v285_v63 = vld [vmem:[%s3171_s25] sm:$0xff]  ;;  %s257_s9 = sadd.s32 %s2237_s8, %s2236_s7 }
  0x26   : > { %2569 = vmatprep.mubr.msk.f32.mxu1 %vm395_vm2, %v3111_v16  ;;  %v388_v21 = vrot.slane %v3881_v8, 2  ;;  %v370_v22 = vrot.slane %v3101_v14, 2  ;;  %v325_v27 = vmax.f32 %v3091_v3, 0.0  ;;  %v3128_v28 = vsel %vm354_vm1, %v366_v59, %v368_v17  ;;  %v3193_v3 = vld [vmem:[%s3171_s25 + $0x10] sm:$0xf]  ;;  %v288_v17 = vld [vmem:[%s3171_s25 + $0x18] sm:$0xff] }
  0x27   : > { %v371_v32 = vrot.slane %v3113_v18, 2  ;;  %v390_v34 = vrot.slane %v3115_v20, 2  ;;  %v3880_v35 = vmax.f32 %v3104_v15, 0.0  ;;  %v391_v38 = vrot.slane %v3122_v23, 2  ;;  %s2238_s13 = sshll.u32 %s257_s9, 3 }
  0x28   : > { %2558 = vmatmul.mubr.msk.f32.gmra.mxu0 %vm395_vm2, %v3128_v28  ;;  %v3136_v37 = vsel %vm354_vm1, %v386_v0, %v388_v21  ;;  %v373_v39 = vrot.slane %v325_v27, 2  ;;  %v757_v41 = vrot.slane %v2963_v6, 4  ;;  %v760_v42 = vrot.slane %v322_v12, 4  ;;  %s3775_s11 = scalar_lea.vmem %s3877_s3, %s2238_s13 }
  0x29   : > { %2570 = vmatmul.mubr.msk.f32.gmra.mxu1 %vm395_vm2, %v3136_v37  ;;  %v3145_v45 = vsel %vm354_vm1, %v370_v22, %v371_v32  ;;  %v393_v49 = vrot.slane %v3880_v35, 2  ;;  %v758_v50 = vrot.slane %v2965_v7, 4  ;;  %v3153_v51 = vsel %vm354_vm1, %v390_v34, %v391_v38  ;;  %v3219_v34 = vld [vmem:[%s3171_s25 + $0x28] sm:$0xf]  ;;  %v296_v35 = vld [vmem:[%s3171_s25 + $0x58] sm:$0xf] }
  0x2a   : > { %2560 = vmatprep.mubr.msk.f32.mxu0 %vm395_vm2, %v3145_v45  ;;  %v3156_v10 = vsel %vm354_vm1, %v371_v32, %v373_v39  ;;  %2572 = vmatprep.mubr.msk.f32.mxu1 %vm395_vm2, %v3153_v51  ;;  %v762_v57 = vrot.slane %v2990_v24, 4  ;;  %v763_v58 = vrot.slane %v3003_v29, 4  ;;  %v765_v60 = vrot.slane %v323_v43, 4  ;;  %v286_v43 = vld [vmem:[%s3171_s25 + $0x8] sm:$0xff]  ;;  %v289_v32 = vld [vmem:[%s3171_s25 + $0x20] sm:$0xff]  ;;  %3888 = vst [vmem:[#allocation2_spill] sm:$0xff] %v3219_v34 }
  0x2b   : > { %v3161_v12 = vsel %vm354_vm1, %v391_v38, %v393_v49  ;;  %v759_v55 = vsel %vm428_vm0, %v757_v41, %v758_v50  ;;  %v761_v59 = vsel %vm428_vm0, %v758_v50, %v760_v42  ;;  %v767_v61 = vrot.slane %v3048_v47, 4 }
  0x2c   : > { %2561 = vmatmul.mubr.msk.f32.gmra.mxu0 %vm395_vm2, %v3156_v10  ;;  %v768_v62 = vrot.slane %v3050_v48, 4  ;;  %v764_v0 = vsel %vm428_vm0, %v762_v57, %v763_v58  ;;  %v770_v2 = vrot.slane %v324_v1, 4  ;;  %v3203_v1 = vld [vmem:[%s3876_s2 + $0x18] sm:$0xf]  ;;  %v3215_v22 = vmax.f32 %v285_v63, 0.0 }
  0x2d   : > { %2573 = vmatmul.mubr.msk.f32.gmra.mxu1 %vm395_vm2, %v3161_v12  ;;  %2603 = vmatprep.mubr.msk.f32.mxu0 %vm395_vm2, %v759_v55  ;;  %v775_v38 = vrot.slane %v325_v27, 4  ;;  %v777_v41 = vrot.slane %v2968_v9, 4  ;;  %v3235_v42 = vmax.f32 %v288_v17, 0.0  ;;  %v3244_v55 = vmax.f32 %v289_v32, 0.0  ;;  %v295_v17 = vld [vmem:[%s3171_s25 + $0x50] sm:$0xff] }
  0x2e   : > { %2577 = vmatprep.mubr.msk.f32.mxu1 %vm395_vm2, %v2963_v6  ;;  %v766_v6 = vsel %vm428_vm0, %v763_v58, %v765_v60  ;;  %v3211_v21 = vsel %vm428_vm0, %v767_v61, %v768_v62  ;;  %v3229_v39 = vsel %vm428_vm0, %v768_v62, %v770_v2  ;;  %v1177_v27 = vrot.slane %v3215_v22, 2  ;;  %v291_v58 = vld [vmem:[%s3171_s25 + $0x30] sm:$0xff]  ;;  %v292_v62 = vld [vmem:[%s3171_s25 + $0x38] sm:$0xff] }
  0x2f   : > { %v3878_v57 = vmax.f32 %v3219_v34, 0.0  ;;  %v780_v60 = vrot.slane %v326_v19, 4  ;;  %v1182_v61 = vrot.slane %v3235_v42, 2  ;;  %v1183_v2 = vrot.slane %v3244_v55, 2 }
  0x30   : > { %2604 = vmatmul.mubr.msk.f32.vlgmr.msra.gmra.mxu0 %vm395_vm2, %v761_v59  ;;  %v778_v59 = vrot.slane %v2973_v11, 4  ;;  %v782_v19 = vrot.slane %v3005_v30, 4  ;;  %v783_v32 = vrot.slane %v3017_v36, 4  ;;  %v1722_v34 = vmax.f32 %v296_v35, 0.0 }
  0x31   : > { %2578 = vmatmul.mubr.msk.f32.vlgmr.msra.gmra.mxu1 %vm395_vm2, %v2965_v7  ;;  %2654 = vmatpush3.msk.msra.mxu0 %vm428_vm0, %v2998_v26  ;;  %v772_v7 = vrot.slane %v3101_v14, 4  ;;  %v773_v26 = vrot.slane %v3113_v18, 4 }
  0x32   : > { %2628 = vmatpush3.msk.msra.mxu1 %vm428_vm0, %v3040_v44  ;;  %2580 = vmatprep.mubr.msk.f32.mxu1 %vm395_vm2, %v2990_v24  ;;  %v3224_v24 = vmax.f32 %v286_v43, 0.0  ;;  %v3879_v44 = vmax.f32 %v3193_v3, 0.0  ;;  %v1185_v43 = vrot.slane %v3878_v57, 2  ;;  %v3298_v57 = vmax.f32 %v295_v17, 0.0 }
  0x33   : > { %2606 = vmatprep.mubr.msk.f32.mxu0 %vm395_vm2, %v764_v0  ;;  %2679 = vmatprep.subr.msk.mxu1 %vm428_vm0, %v3189_v25  ;;  %v3272_v13 = vsel %vm428_vm0, %v773_v26, %v775_v38  ;;  %v293_v38 = vld [vmem:[%s3171_s25 + $0x40] sm:$0xf]  ;;  %v3319_v31 = vsel %vm428_vm0, %v782_v19, %v783_v32 }
  0x34   : > { %2607 = vmatmul.mubr.msk.f32.gmra.mxu0 %vm395_vm2, %v766_v6  ;;  %2705 = vmatprep.subr.msk.mxu0 %vm428_vm0, %v3203_v1  ;;  %v1178_v49 = vrot.slane %v3224_v24, 2  ;;  %v1180_v50 = vrot.slane %v3879_v44, 2  ;;  %v294_v6 = vld [vmem:[%s3171_s25 + $0x48] sm:$0xff]  ;;  %v1731_v8 = vrot.slane %v3298_v57, 2 }
  0x35   : > { %2581 = vmatmul.mubr.msk.f32.gmra.mxu1 %vm395_vm2, %v3003_v29  ;;  %2609 = vmatprep.mubr.msk.f32.mxu0 %vm395_vm2, %v3211_v21  ;;  %v3251_v29 = vsel %vm428_vm0, %v772_v7, %v773_v26  ;;  %v3275_v7 = vmax.f32 %v291_v58, 0.0  ;;  %v3288_v26 = vmax.f32 %v292_v62, 0.0  ;;  %v3296_v58 = vmax.f32 %v294_v6, 0.0 }
  0x36   : > { %2583 = vmatprep.mubr.msk.f32.mxu1 %vm395_vm2, %v3048_v47  ;;  %v3259_v63 = vsel %vm354_vm1, %v1177_v27, %v1178_v49  ;;  %v3262_v0 = vsel %vm354_vm1, %v1178_v49, %v1180_v50  ;;  %v3283_v27 = vsel %vm354_vm1, %v1182_v61, %v1183_v2  ;;  %v3286_v49 = vsel %vm354_vm1, %v1183_v2, %v1185_v43 }
  0x37   : > { %3889 = vst [vmem:[#allocation3_spill] sm:$0xff] %v3275_v7  ;;  %v3294_v50 = vsel %vm428_vm0, %v777_v41, %v778_v59  ;;  %3890 = vst [vmem:[#allocation4_spill] sm:$0xff] %v3296_v58  ;;  %v1725_v44 = vrot.slane %v3275_v7, 2  ;;  %v3302_v61 = vsel %vm428_vm0, %v778_v59, %v780_v60  ;;  %v785_v62 = vrot.slane %v327_v46, 4 }
  0x38   : > { %2610 = vmatmul.mubr.msk.f32.gmra.mxu0 %vm395_vm2, %v3229_v39  ;;  %v787_v2 = vrot.slane %v3060_v52, 4  ;;  %v1726_v43 = vrot.slane %v3288_v26, 2  ;;  %v1721_v6 = vmax.f32 %v293_v38, 0.0  ;;  %v1730_v17 = vrot.slane %v3296_v58, 2 }
  0x39   : > { %2584 = vmatmul.mubr.msk.f32.gmra.mxu1 %vm395_vm2, %v3050_v48  ;;  %2612 = vmatprep.mubr.msk.f32.mxu0 %vm395_vm2, %v3251_v29  ;;  %v788_v46 = vrot.slane %v3062_v53, 4  ;;  %v1733_v60 = vrot.slane %v1722_v34, 2  ;;  %v1915_v7 = vrot.slane %v1722_v34, 4  ;;  %v3346_v35 = vsel %vm428_vm0, %v783_v32, %v785_v62 }
  0x3a   : > { %2586 = vmatprep.mubr.msk.f32.mxu1 %vm395_vm2, %v3101_v14  ;;  %v3323_v59 = vsel %vm354_vm1, %v1725_v44, %v1726_v43  ;;  %v1728_v38 = vrot.slane %v1721_v6, 2  ;;  %v1910_v41 = vrot.slane %v1721_v6, 4  ;;  %v3329_v58 = vsel %vm354_vm1, %v1730_v17, %v1731_v8 }
  0x3b   : > { %3891 = vst [vmem:[#allocation5_spill] sm:$0xff] %v3323_v59  ;;  %v3892_v44 = vrot.slane %v3288_v26, 4  ;;  %v3893_v6 = vmax.f32 %v3065_v54, 0.0  ;;  %v792_v17 = vrot.slane %v3115_v20, 4  ;;  %v793_v34 = vrot.slane %v3122_v23, 4 }
  0x3c   : > { %2613 = vmatmul.mubr.msk.f32.gmra.mxu0 %vm395_vm2, %v3272_v13  ;;  %v3334_v19 = vsel %vm354_vm1, %v1726_v43, %v1728_v38  ;;  %v3358_v38 = vsel %vm354_vm1, %v1731_v8, %v1733_v60  ;;  %v3895_v8 = vmax.f32 %v3104_v15, 0.0  ;;  %v304_v15 = vld [vmem:[%s3876_s2 + $0x1c] sm:$0xf] }
  0x3d   : > { %2587 = vmatmul.mubr.msk.f32.gmra.mxu1 %vm395_vm2, %v3113_v18  ;;  %2615 = vmatprep.mubr.msk.f32.mxu0 %vm395_vm2, %v3294_v50  ;;  %v3339_v59 = vsel %vm428_vm0, %v3892_v44, %v1910_v41  ;;  %v790_v43 = vrot.slane %v3893_v6, 4  ;;  %v3354_v41 = vsel %vm428_vm0, %v787_v2, %v788_v46  ;;  %v3894_v44 = vrot.slane %v3298_v57, 4 }
  0x3e   : > { %2589 = vmatprep.mubr.msk.f32.mxu1 %vm395_vm2, %v2968_v9  ;;  %v795_v62 = vrot.slane %v3895_v8, 4 }
  0x3f   : > { %v3363_v32 = vsel %vm428_vm0, %v3894_v44, %v1915_v7  ;;  %v3372_v54 = vsel %vm428_vm0, %v788_v46, %v790_v43  ;;  %v3379_v7 = vsel %vm428_vm0, %v792_v17, %v793_v34 }
  0x40   : > { %2616 = vmatmul.mubr.msk.f32.gmra.mxu0 %vm395_vm2, %v3302_v61  ;;  %v3388_v2 = vsel %vm428_vm0, %v793_v34, %v795_v62 }
  0x41   : > { %2590 = vmatmul.mubr.msk.f32.gmra.mxu1 %vm395_vm2, %v2973_v11  ;;  %2618 = vmatprep.mubr.msk.f32.mxu0 %vm395_vm2, %v3319_v31 }
  0x42   : > { %2592 = vmatprep.mubr.msk.f32.mxu1 %vm395_vm2, %v3005_v30 }
  0x44   : > { %2619 = vmatmul.mubr.msk.f32.gmra.mxu0 %vm395_vm2, %v3346_v35 }
  0x45   : > { %2593 = vmatmul.mubr.msk.f32.gmra.mxu1 %vm395_vm2, %v3017_v36  ;;  %2621 = vmatprep.mubr.msk.f32.mxu0 %vm395_vm2, %v3354_v41 }
  0x46   : > { %2595 = vmatprep.mubr.msk.f32.mxu1 %vm395_vm2, %v3060_v52 }
  0x48   : > { %2622 = vmatmul.mubr.msk.f32.gmra.mxu0 %vm395_vm2, %v3372_v54 }
  0x49   : > { %2596 = vmatmul.mubr.msk.f32.gmra.mxu1 %vm395_vm2, %v3062_v53  ;;  %2624 = vmatprep.mubr.msk.f32.mxu0 %vm395_vm2, %v3379_v7 }
  0x4a   : > { %2598 = vmatprep.mubr.msk.f32.mxu1 %vm395_vm2, %v3115_v20 }
  0x4c   : > { %2625 = vmatmul.mubr.msk.f32.gmra.mxu0 %vm395_vm2, %v3388_v2 }
  0x4d   : > { %2599 = vmatmul.mubr.msk.f32.gmra.mxu1 %vm395_vm2, %v3122_v23  ;;  %2655 = vmatprep.mubr.msk.f32.mxu0 %vm395_vm2, %v3098_v5  ;;  %v305_v5 = vld [vmem:[%s3876_s2 + $0x20] sm:$0xf] }
  0x4e   : > { %2629 = vmatprep.mubr.msk.f32.mxu1 %vm395_vm2, %v3048_v47 }
  0x50   : > { %2656 = vmatmul.mubr.msk.f32.vlgmr.msra.gmra.mxu0 %vm395_vm2, %v3128_v28 }
  0x51   : > { %2630 = vmatmul.mubr.msk.f32.vlgmr.msra.gmra.mxu1 %vm395_vm2, %v3050_v48  ;;  %2706 = vmatpush3.msk.msra.mxu0 %vm428_vm0, %v3203_v1  ;;  %v1364_v48 = vrot.slane %v3235_v42, 4 }
  0x52   : > { %2680 = vmatpush3.msk.msra.mxu1 %vm428_vm0, %v3189_v25  ;;  %2632 = vmatprep.mubr.msk.f32.mxu1 %vm395_vm2, %v3101_v14 }
  0x53   : > { %2658 = vmatprep.mubr.msk.f32.mxu0 %vm395_vm2, %v3145_v45  ;;  %2731 = vmatprep.subr.msk.mxu1 %vm428_vm0, %v304_v15  ;;  %v3900_v45 = vld [vmem:[#allocation4_spill] sm:$0xff] }
  0x54   : > { %2659 = vmatmul.mubr.msk.f32.gmra.mxu0 %vm395_vm2, %v3156_v10  ;;  %2757 = vmatprep.subr.msk.mxu0 %vm428_vm0, %v305_v5 }
  0x55   : > { %2633 = vmatmul.mubr.msk.f32.gmra.mxu1 %vm395_vm2, %v3113_v18  ;;  %2661 = vmatprep.mubr.msk.f32.mxu0 %vm395_vm2, %v3013_v33  ;;  %v3898_v18 = vld [vmem:[#allocation2_spill] sm:$0xff] }
  0x56   : > { %2635 = vmatprep.mubr.msk.f32.mxu1 %vm395_vm2, %v2968_v9 }
  0x58   : > { %2662 = vmatmul.mubr.msk.f32.gmra.mxu0 %vm395_vm2, %v3032_v40 }
  0x59   : > { %2636 = vmatmul.mubr.msk.f32.gmra.mxu1 %vm395_vm2, %v2973_v11  ;;  %2664 = vmatprep.mubr.msk.f32.mxu0 %vm395_vm2, %v3072_v56 }
  0x5a   : > { %2638 = vmatprep.mubr.msk.f32.mxu1 %vm395_vm2, %v3005_v30 }
  0x5c   : > { %2665 = vmatmul.mubr.msk.f32.gmra.mxu0 %vm395_vm2, %v3095_v4 }
  0x5d   : > { %2639 = vmatmul.mubr.msk.f32.gmra.mxu1 %vm395_vm2, %v3017_v36  ;;  %2667 = vmatprep.mubr.msk.f32.mxu0 %vm395_vm2, %v3111_v16 }
  0x5e   : > { %2641 = vmatprep.mubr.msk.f32.mxu1 %vm395_vm2, %v3060_v52 }
  0x60   : > { %2668 = vmatmul.mubr.msk.f32.gmra.mxu0 %vm395_vm2, %v3136_v37 }
  0x61   : > { %2642 = vmatmul.mubr.msk.f32.gmra.mxu1 %vm395_vm2, %v3062_v53  ;;  %2670 = vmatprep.mubr.msk.f32.mxu0 %vm395_vm2, %v3153_v51 }
  0x62   : > { %2644 = vmatprep.mubr.msk.f32.mxu1 %vm395_vm2, %v3115_v20 }
  0x64   : > { %2671 = vmatmul.mubr.msk.f32.gmra.mxu0 %vm395_vm2, %v3161_v12 }
  0x65   : > { %2645 = vmatmul.mubr.msk.f32.gmra.mxu1 %vm395_vm2, %v3122_v23  ;;  %2673 = vmatprep.mubr.msk.f32.mxu0 %vm395_vm2, %v3259_v63 }
  0x66   : > { %2647 = vmatprep.mubr.msk.f32.mxu1 %vm395_vm2, %v3215_v22 }
  0x68   : > { %2674 = vmatmul.mubr.msk.f32.gmra.mxu0 %vm395_vm2, %v3262_v0 }
  0x69   : > { %2648 = vmatmul.mubr.msk.f32.gmra.mxu1 %vm395_vm2, %v3224_v24  ;;  %2676 = vmatprep.mubr.msk.f32.mxu0 %vm395_vm2, %v3283_v27 }
  0x6a   : > { %2650 = vmatprep.mubr.msk.f32.mxu1 %vm395_vm2, %v3235_v42 }
  0x6c   : > { %2677 = vmatmul.mubr.msk.f32.gmra.mxu0 %vm395_vm2, %v3286_v49 }
  0x6d   : > { %2651 = vmatmul.mubr.msk.f32.gmra.mxu1 %vm395_vm2, %v3244_v55  ;;  %2707 = vmatprep.mubr.msk.f32.mxu0 %vm395_vm2, %v2968_v9  ;;  %v1359_v9 = vrot.slane %v3215_v22, 4 }
  0x6e   : > { %2681 = vmatprep.mubr.msk.f32.mxu1 %vm395_vm2, %v3211_v21 }
  0x70   : > { %2708 = vmatmul.mubr.msk.f32.vlgmr.msra.gmra.mxu0 %vm395_vm2, %v2973_v11  ;;  %v1360_v11 = vrot.slane %v3224_v24, 4 }
  0x71   : > { %2682 = vmatmul.mubr.msk.f32.vlgmr.msra.gmra.mxu1 %vm395_vm2, %v3229_v39  ;;  %2758 = vmatpush3.msk.msra.mxu0 %vm428_vm0, %v305_v5 }
  0x72   : > { %2732 = vmatpush3.msk.msra.mxu1 %vm428_vm0, %v304_v15  ;;  %2684 = vmatprep.mubr.msk.f32.mxu1 %vm395_vm2, %v3251_v29  ;;  %v1361_v47 = vsel %vm428_vm0, %v1359_v9, %v1360_v11 }
  0x73   : > { %2710 = vmatprep.mubr.msk.f32.mxu0 %vm395_vm2, %v3005_v30  ;;  %v3896_v30 = vmax.f32 %v3193_v3, 0.0 }
  0x74   : > { %2711 = vmatmul.mubr.msk.f32.gmra.mxu0 %vm395_vm2, %v3017_v36 }
  0x75   : > { %2685 = vmatmul.mubr.msk.f32.gmra.mxu1 %vm395_vm2, %v3272_v13  ;;  %2713 = vmatprep.mubr.msk.f32.mxu0 %vm395_vm2, %v3060_v52  ;;  %v1362_v36 = vrot.slane %v3896_v30, 4  ;;  %v1365_v52 = vrot.slane %v3244_v55, 4 }
  0x76   : > { %2687 = vmatprep.mubr.msk.f32.mxu1 %vm395_vm2, %v3294_v50 }
  0x77   : > { %v1363_v14 = vsel %vm428_vm0, %v1360_v11, %v1362_v36  ;;  %v1366_v28 = vsel %vm428_vm0, %v1364_v48, %v1365_v52 }
  0x78   : > { %2714 = vmatmul.mubr.msk.f32.gmra.mxu0 %vm395_vm2, %v3062_v53  ;;  %v3897_v53 = vld [vmem:[#allocation3_spill] sm:$0xff] }
  0x79   : > { %2688 = vmatmul.mubr.msk.f32.gmra.mxu1 %vm395_vm2, %v3302_v61  ;;  %2716 = vmatprep.mubr.msk.f32.mxu0 %vm395_vm2, %v3115_v20  ;;  %v3899_v20 = vmax.f32 %v3898_v18, 0.0 }
  0x7a   : > { %2690 = vmatprep.mubr.msk.f32.mxu1 %vm395_vm2, %v3319_v31 }
  0x7c   : > { %2717 = vmatmul.mubr.msk.f32.gmra.mxu0 %vm395_vm2, %v3122_v23  ;;  %v1367_v23 = vrot.slane %v3899_v20, 4 }
  0x7d   : > { %2691 = vmatmul.mubr.msk.f32.gmra.mxu1 %vm395_vm2, %v3346_v35  ;;  %2719 = vmatprep.mubr.msk.f32.mxu0 %vm395_vm2, %v3215_v22 }
  0x7e   : > { %2693 = vmatprep.mubr.msk.f32.mxu1 %vm395_vm2, %v3354_v41  ;;  %v1368_v10 = vsel %vm428_vm0, %v1365_v52, %v1367_v23 }
  0x80   : > { %2720 = vmatmul.mubr.msk.f32.gmra.mxu0 %vm395_vm2, %v3224_v24 }
  0x81   : > { %2694 = vmatmul.mubr.msk.f32.gmra.mxu1 %vm395_vm2, %v3372_v54  ;;  %2722 = vmatprep.mubr.msk.f32.mxu0 %vm395_vm2, %v3235_v42 }
  0x82   : > { %2696 = vmatprep.mubr.msk.f32.mxu1 %vm395_vm2, %v3379_v7 }
  0x84   : > { %2723 = vmatmul.mubr.msk.f32.gmra.mxu0 %vm395_vm2, %v3244_v55 }
  0x85   : > { %2697 = vmatmul.mubr.msk.f32.gmra.mxu1 %vm395_vm2, %v3388_v2  ;;  %2725 = vmatprep.mubr.msk.f32.mxu0 %vm395_vm2, %v3897_v53 }
  0x86   : > { %2699 = vmatprep.mubr.msk.f32.mxu1 %vm395_vm2, %v1361_v47 }
  0x88   : > { %2726 = vmatmul.mubr.msk.f32.gmra.mxu0 %vm395_vm2, %v3288_v26 }
  0x89   : > { %2700 = vmatmul.mubr.msk.f32.gmra.mxu1 %vm395_vm2, %v1363_v14  ;;  %2728 = vmatprep.mubr.msk.f32.mxu0 %vm395_vm2, %v3900_v45 }
  0x8a   : > { %2702 = vmatprep.mubr.msk.f32.mxu1 %vm395_vm2, %v1366_v28 }
  0x8c   : > { %2729 = vmatmul.mubr.msk.f32.gmra.mxu0 %vm395_vm2, %v3298_v57 }
  0x8d   : > { %2703 = vmatmul.mubr.msk.f32.gmra.mxu1 %vm395_vm2, %v1368_v10  ;;  %2759 = vmatprep.mubr.msk.f32.mxu0 %vm395_vm2, %v3294_v50 }
  0x8e   : > { %2733 = vmatprep.mubr.msk.f32.mxu1 %vm395_vm2, %v3013_v33  ;;  %v1907_v33 = vrot.slane %v3897_v53, 4 }
  0x90   : > { %2760 = vmatmul.mubr.msk.f32.vlgmr.msra.gmra.mxu0 %vm395_vm2, %v3302_v61 }
  0x91   : > { %2734 = vmatmul.mubr.msk.f32.vlgmr.msra.gmra.mxu1 %vm395_vm2, %v3032_v40  ;;  %2762 = vmatprep.mubr.msk.f32.mxu0 %vm395_vm2, %v3319_v31  ;;  %v3901_v40 = vrot.slane %v3288_v26, 4 }
  0x92   : > { %2736 = vmatprep.mubr.msk.f32.mxu1 %vm395_vm2, %v3072_v56 }
  0x93   : > { %v1909_v56 = vsel %vm428_vm0, %v1907_v33, %v3901_v40 }
  0x94   : > { %2763 = vmatmul.mubr.msk.f32.gmra.mxu0 %vm395_vm2, %v3346_v35 }
  0x95   : > { %2737 = vmatmul.mubr.msk.f32.gmra.mxu1 %vm395_vm2, %v3095_v4  ;;  %2765 = vmatprep.mubr.msk.f32.mxu0 %vm395_vm2, %v3354_v41  ;;  %v1912_v4 = vrot.slane %v3900_v45, 4 }
  0x96   : > { %2739 = vmatprep.mubr.msk.f32.mxu1 %vm395_vm2, %v3111_v16  ;;  %v3902_v16 = vld [vmem:[#allocation5_spill] sm:$0xff] }
  0x98   : > { %2766 = vmatmul.mubr.msk.f32.gmra.mxu0 %vm395_vm2, %v3372_v54 }
  0x99   : > { %2740 = vmatmul.mubr.msk.f32.gmra.mxu1 %vm395_vm2, %v3136_v37  ;;  %2768 = vmatprep.mubr.msk.f32.mxu0 %vm395_vm2, %v3379_v7  ;;  %v3903_v37 = vmov %v3894_v44 }
  0x9a   : > { %2742 = vmatprep.mubr.msk.f32.mxu1 %vm395_vm2, %v3153_v51  ;;  %v1914_v51 = vsel %vm428_vm0, %v1912_v4, %v3903_v37 }
  0x9c   : > { %2769 = vmatmul.mubr.msk.f32.gmra.mxu0 %vm395_vm2, %v3388_v2 }
  0x9d   : > { %2743 = vmatmul.mubr.msk.f32.gmra.mxu1 %vm395_vm2, %v3161_v12  ;;  %2771 = vmatprep.mubr.msk.f32.mxu0 %vm395_vm2, %v1361_v47 }
  0x9e   : > { %2745 = vmatprep.mubr.msk.f32.mxu1 %vm395_vm2, %v3259_v63 }
  0xa0   : > { %2772 = vmatmul.mubr.msk.f32.gmra.mxu0 %vm395_vm2, %v1363_v14 }
  0xa1   : > { %2746 = vmatmul.mubr.msk.f32.gmra.mxu1 %vm395_vm2, %v3262_v0  ;;  %2774 = vmatprep.mubr.msk.f32.mxu0 %vm395_vm2, %v1366_v28 }
  0xa2   : > { %2748 = vmatprep.mubr.msk.f32.mxu1 %vm395_vm2, %v3283_v27 }
  0xa4   : > { %2775 = vmatmul.mubr.msk.f32.gmra.mxu0 %vm395_vm2, %v1368_v10 }
  0xa5   : > { %2749 = vmatmul.mubr.msk.f32.gmra.mxu1 %vm395_vm2, %v3286_v49  ;;  %2777 = vmatprep.mubr.msk.f32.mxu0 %vm395_vm2, %v1909_v56 }
  0xa6   : > { %2751 = vmatprep.mubr.msk.f32.mxu1 %vm395_vm2, %v3902_v16 }
  0xa8   : > { %2778 = vmatmul.mubr.msk.f32.gmra.mxu0 %vm395_vm2, %v3339_v59 }
  0xa9   : > { %2752 = vmatmul.mubr.msk.f32.gmra.mxu1 %vm395_vm2, %v3334_v19  ;;  %2780 = vmatprep.mubr.msk.f32.mxu0 %vm395_vm2, %v1914_v51 }
  0xaa   : > { %2754 = vmatprep.mubr.msk.f32.mxu1 %vm395_vm2, %v3329_v58 }
  0xac   : > { %2781 = vmatmul.mubr.msk.f32.gmra.mxu0 %vm395_vm2, %v3363_v32 }
  0xad   : > { %2755 = vmatmul.mubr.msk.f32.gmra.mxu1 %vm395_vm2, %v3358_v38 }
  0xdf   : > { %v2553_v12 = vpop.f32.mrf.mxu0 }
  0xe0   : > { %v2565_v25 = vpop.f32.mrf.mxu1 }
  0xe1   : > { %v498_v3 = vpop.f32.mrf.mxu0 }
  0xe2   : > { %v538_v1 = vpop.f32.mrf.mxu1 }
  0xe4   : > { %v2556_v21 = vpop.f32.mrf.mxu0  ;;  %v2568_v22 = vpop.f32.mrf.mxu1 }
  0xe6   : > { %v508_v24 = vpop.f32.mrf.mxu0  ;;  %v548_v39 = vpop.f32.mrf.mxu1 }
  0xe8   : > { %v2559_v42 = vpop.f32.mrf.mxu0 }
  0xe9   : > { %v2571_v55 = vpop.f32.mrf.mxu1 }
  0xea   : > { %v518_v57 = vpop.f32.mrf.mxu0 }
  0xeb   : > { %v558_v29 = vpop.f32.mrf.mxu1 }
  0xec   : > { %v2562_v63 = vpop.f32.mrf.mxu0 }
  0xed   : > { %v2574_v0 = vpop.f32.mrf.mxu1 }
  0xee   : > { %v528_v13 = vpop.f32.mrf.mxu0 }
  0xef   : > { %v3612_v27 = vpop.f32.mrf.mxu1 }
  0xf0   : > { %v2605_v49 = vpop.f32.mrf.mxu0 }
  0xf1   : > { %v2579_v26 = vpop.f32.mrf.mxu1 }
  0xf2   : > { %v684_v50 = vadd.f32 %v2579_v26, %v2553_v12  ;;  %v898_v58 = vpop.f32.mrf.mxu0 }
  0xf3   : > { %v678_v61 = vpop.f32.mrf.mxu1 }
  0xf4   : > { %v3614_v31 = vadd.f32 %v2605_v49, %v684_v50  ;;  %v679_v46 = vadd.f32 %v678_v61, %v498_v3  ;;  %v2608_v59 = vpop.f32.mrf.mxu0 }
  0xf5   : > { %v2582_v60 = vpop.f32.mrf.mxu1 }
  0xf6   : > { %v3616_v19 = vadd.f32 %v898_v58, %v679_v46  ;;  %v694_v35 = vadd.f32 %v2582_v60, %v2556_v21  ;;  %v908_v6 = vpop.f32.mrf.mxu0 }
  0xf7   : > { %v688_v43 = vpop.f32.mrf.mxu1 }
  0xf8   : > { %v3618_v17 = vadd.f32 %v2608_v59, %v694_v35  ;;  %v689_v41 = vadd.f32 %v688_v43, %v508_v24  ;;  %v2611_v34 = vpop.f32.mrf.mxu0 }
  0xf9   : > { %v2585_v38 = vpop.f32.mrf.mxu1 }
  0xfa   : > { %v3620_v44 = vadd.f32 %v908_v6, %v689_v41  ;;  %v704_v32 = vadd.f32 %v2585_v38, %v2559_v42  ;;  %v918_v54 = vpop.f32.mrf.mxu0 }
  0xfb   : > { %v698_v8 = vpop.f32.mrf.mxu1 }
  0xfc   : > { %v3622_v62 = vadd.f32 %v2611_v34, %v704_v32  ;;  %v699_v7 = vadd.f32 %v698_v8, %v518_v57  ;;  %v2614_v2 = vpop.f32.mrf.mxu0 }
  0xfd   : > { %v2588_v15 = vpop.f32.mrf.mxu1 }
  0xfe   : > { %v3624_v5 = vadd.f32 %v918_v54, %v699_v7  ;;  %v714_v9 = vadd.f32 %v2588_v15, %v2562_v63  ;;  %v928_v11 = vpop.f32.mrf.mxu0 }
  0xff   : > { %v708_v30 = vpop.f32.mrf.mxu1 }
 0x100   : > { %v3626_v36 = vadd.f32 %v2614_v2, %v714_v9  ;;  %v709_v47 = vadd.f32 %v708_v30, %v528_v13  ;;  %v2617_v48 = vpop.f32.mrf.mxu0 }
 0x101   : > { %v2591_v52 = vpop.f32.mrf.mxu1 }
 0x102   : > { %v3628_v53 = vadd.f32 %v928_v11, %v709_v47  ;;  %v724_v14 = vadd.f32 %v2591_v52, %v2565_v25  ;;  %v938_v18 = vpop.f32.mrf.mxu0 }
 0x103   : > { %v718_v20 = vpop.f32.mrf.mxu1 }
 0x104   : > { %v3630_v23 = vadd.f32 %v2617_v48, %v724_v14  ;;  %v719_v28 = vadd.f32 %v718_v20, %v538_v1  ;;  %v2620_v45 = vpop.f32.mrf.mxu0 }
 0x105   : > { %v2594_v10 = vpop.f32.mrf.mxu1 }
 0x106   : > { %v3632_v33 = vadd.f32 %v938_v18, %v719_v28  ;;  %v734_v40 = vadd.f32 %v2594_v10, %v2568_v22  ;;  %v948_v56 = vpop.f32.mrf.mxu0 }
 0x107   : > { %v728_v4 = vpop.f32.mrf.mxu1 }
 0x108   : > { %v3634_v16 = vadd.f32 %v2620_v45, %v734_v40  ;;  %v729_v37 = vadd.f32 %v728_v4, %v548_v39  ;;  %v2623_v51 = vpop.f32.mrf.mxu0 }
 0x109   : > { %v2597_v12 = vpop.f32.mrf.mxu1 }
 0x10a   : > { %v3636_v3 = vadd.f32 %v948_v56, %v729_v37  ;;  %v744_v25 = vadd.f32 %v2597_v12, %v2571_v55  ;;  %v958_v21 = vpop.f32.mrf.mxu0 }
 0x10b   : > { %v738_v24 = vpop.f32.mrf.mxu1 }
 0x10c   : > { %v3638_v42 = vadd.f32 %v2623_v51, %v744_v25  ;;  %v739_v1 = vadd.f32 %v738_v24, %v558_v29  ;;  %v2626_v57 = vpop.f32.mrf.mxu0 }
 0x10d   : > { %v2600_v63 = vpop.f32.mrf.mxu1 }
 0x10e   : > { %v3640_v13 = vadd.f32 %v958_v21, %v739_v1  ;;  %v754_v22 = vadd.f32 %v2600_v63, %v2574_v0  ;;  %v968_v49 = vpop.f32.mrf.mxu0 }
 0x10f   : > { %v748_v26 = vpop.f32.mrf.mxu1 }
 0x110   : > { %3904 = vst [vmem:[#allocation3_spill] sm:$0xff] %v3640_v13  ;;  %v3642_v50 = vadd.f32 %v2626_v57, %v754_v22  ;;  %v749_v39 = vadd.f32 %v748_v26, %v3612_v27  ;;  %v3645_v58 = vpop.f32.mrf.mxu0 }
 0x111   : > { %v2631_v61 = vpop.f32.mrf.mxu1 }
 0x112   : > { %3905 = vst [vmem:[#allocation2_spill] sm:$0xff] %v3642_v50  ;;  %v3647_v55 = vadd.f32 %v968_v49, %v749_v39  ;;  %v3649_v46 = vpop.f32.mrf.mxu0  ;;  %v1158_v50 = vadd.f32 %v2631_v61, %v3614_v31 }
 0x113   : > { %v1078_v59 = vpop.f32.mrf.mxu1 }
 0x114   : > { %3906 = vst [vmem:[#allocation4_spill] sm:$0xff] %v3647_v55  ;;  %v3651_v29 = vpop.f32.mrf.mxu0 }
 0x115   : > { %v2634_v60 = vpop.f32.mrf.mxu1 }
 0x116   : > { %v3653_v35 = vpop.f32.mrf.mxu0 }
 0x117   : > { %v1088_v0 = vpop.f32.mrf.mxu1 }
 0x118   : > { %v3655_v6 = vpop.f32.mrf.mxu0 }
 0x119   : > { %v3657_v43 = vpop.f32.mrf.mxu1 }
 0x11a   : > { %v3659_v41 = vpop.f32.mrf.mxu0 }
 0x11b   : > { %v3661_v27 = vpop.f32.mrf.mxu1 }
 0x11c   : > { %v3663_v34 = vpop.f32.mrf.mxu0 }
 0x11d   : > { %v3665_v38 = vpop.f32.mrf.mxu1 }
 0x11e   : > { %v3667_v32 = vpop.f32.mrf.mxu0 }
 0x11f   : > { %v3669_v54 = vpop.f32.mrf.mxu1 }
 0x120   : > { %v3671_v8 = vpop.f32.mrf.mxu0 }
 0x121   : > { %v3673_v7 = vpop.f32.mrf.mxu1 }
 0x122   : > { %v3675_v2 = vpop.f32.mrf.mxu0 }
 0x123   : > { %v3677_v15 = vpop.f32.mrf.mxu1 }
 0x124   : > { %v3679_v9 = vpop.f32.mrf.mxu0 }
 0x125   : > { %v3681_v11 = vpop.f32.mrf.mxu1 }
 0x126   : > { %v3683_v30 = vpop.f32.mrf.mxu0 }
 0x127   : > { %3907 = vst [vmem:[#allocation5_spill] sm:$0xff] %v3683_v30  ;;  %v3685_v47 = vpop.f32.mrf.mxu1  ;;  %v1344_v30 = vadd.f32 %v3645_v58, %v1158_v50 }
 0x128   : > { %v3687_v48 = vpop.f32.mrf.mxu0 }
 0x129   : > { %3908 = vst [vmem:[#allocation6_spill] sm:$0xff] %v3687_v48  ;;  %v3689_v52 = vpop.f32.mrf.mxu1 }
 0x12a   : > { %v3691_v14 = vpop.f32.mrf.mxu0 }
 0x12b   : > { %3909 = vst [vmem:[#allocation7_spill] sm:$0xff] %v3691_v14  ;;  %v3693_v18 = vpop.f32.mrf.mxu1 }
 0x12c   : > { %3910 = vst [vmem:[#allocation8_spill] sm:$0xff] %v3693_v18  ;;  %v3695_v20 = vpop.f32.mrf.mxu0 }
 0x12d   : > { %3911 = vst [vmem:[#allocation9_spill] sm:$0xff] %v3695_v20  ;;  %v3697_v28 = vpop.f32.mrf.mxu1 }
 0x12e   : > { %3912 = vst [vmem:[#allocation10_spill] sm:$0xff] %v3697_v28  ;;  %v3699_v45 = vpop.f32.mrf.mxu0 }
 0x12f   : > { %3913 = vst [vmem:[#allocation11_spill] sm:$0xff] %v3699_v45  ;;  %v3701_v10 = vpop.f32.mrf.mxu1 }
 0x130   : > { %3914 = vst [vmem:[#allocation12_spill] sm:$0xff] %v3701_v10  ;;  %v2709_v40 = vpop.f32.mrf.mxu0 }
 0x131   : > { %v2683_v56 = vpop.f32.mrf.mxu1 }
 0x132   : > { %v1626_v4 = vpop.f32.mrf.mxu0 }
 0x133   : > { %v1446_v37 = vpop.f32.mrf.mxu1 }
 0x134   : > { %v2712_v51 = vpop.f32.mrf.mxu0 }
 0x135   : > { %v2686_v12 = vpop.f32.mrf.mxu1 }
 0x136   : > { %v3703_v25 = vpop.f32.mrf.mxu0 }
 0x137   : > { %v1456_v21 = vpop.f32.mrf.mxu1 }
 0x138   : > { %v3705_v24 = vpop.f32.mrf.mxu0 }
 0x139   : > { %v2689_v1 = vpop.f32.mrf.mxu1 }
 0x13a   : > { %v3707_v57 = vpop.f32.mrf.mxu0 }
 0x13b   : > { %v3709_v63 = vpop.f32.mrf.mxu1 }
 0x13c   : > { %v3711_v22 = vpop.f32.mrf.mxu0 }
 0x13d   : > { %v3713_v49 = vpop.f32.mrf.mxu1 }
 0x13e   : > { %v3715_v26 = vpop.f32.mrf.mxu0 }
 0x13f   : > { %v3717_v39 = vpop.f32.mrf.mxu1 }
 0x140   : > { %v3719_v45 = vpop.f32.mrf.mxu0 }
 0x141   : > { %3915 = vst [vmem:[#allocation13_spill] sm:$0xff] %v3719_v45  ;;  %v3721_v20 = vpop.f32.mrf.mxu1  ;;  %v1157_v45 = vadd.f32 %v1078_v59, %v3616_v19 }
 0x142   : > { %v3723_v10 = vpop.f32.mrf.mxu0 }
 0x143   : > { %3916 = vst [vmem:[#allocation14_spill] sm:$0xff] %v3723_v10  ;;  %v3726_v55 = vpop.f32.mrf.mxu1  ;;  %v1343_v61 = vadd.f32 %v3649_v46, %v1157_v45 }
 0x144   : > { %3917 = vst [vmem:[#allocation15_spill] sm:$0xff] %v3726_v55  ;;  %v3728_v14 = vpop.f32.mrf.mxu0  ;;  %v1160_v55 = vadd.f32 %v2634_v60, %v3618_v17  ;;  %v1162_v17 = vadd.f32 %v3657_v43, %v3622_v62 }
 0x145   : > { %3918 = vst [vmem:[#allocation16_spill] sm:$0xff] %v3728_v14  ;;  %v3730_v28 = vpop.f32.mrf.mxu1  ;;  %v1525_v58 = vadd.f32 %v1446_v37, %v1343_v61 }
 0x146   : > { %v3733_v48 = vpop.f32.mrf.mxu0  ;;  %v1346_v50 = vadd.f32 %v3651_v29, %v1160_v55  ;;  %v1164_v55 = vadd.f32 %v3665_v38, %v3626_v36  ;;  %v1348_v62 = vadd.f32 %v3655_v6, %v1162_v17 }
 0x147   : > { %3919 = vst [vmem:[#allocation17_spill] sm:$0xff] %v3733_v48  ;;  %v3736_v18 = vpop.f32.mrf.mxu1  ;;  %v1159_v48 = vadd.f32 %v1088_v0, %v3620_v44  ;;  %v1705_v43 = vadd.f32 %v1626_v4, %v1525_v58  ;;  %v1168_v58 = vadd.f32 %v3681_v11, %v3634_v16 }
 0x148   : > { %3920 = vst [vmem:[#allocation18_spill] sm:$0xff] %v3736_v18  ;;  %v3739_v13 = vpop.f32.mrf.mxu0  ;;  %v1526_v18 = vadd.f32 %v2683_v56, %v1344_v30  ;;  %v1528_v30 = vadd.f32 %v2686_v12, %v1346_v50  ;;  %v1530_v38 = vadd.f32 %v2689_v1, %v1348_v62  ;;  %v1165_v1 = vadd.f32 %v3677_v15, %v3632_v33 }
 0x149   : > { %v3741_v10 = vpop.f32.mrf.mxu1  ;;  %v1345_v44 = vadd.f32 %v3653_v35, %v1159_v48 }
 0x14a   : > { %v3745_v14 = vpop.f32.mrf.mxu0  ;;  %v1706_v0 = vadd.f32 %v2709_v40, %v1526_v18  ;;  %v1708_v35 = vadd.f32 %v2712_v51, %v1528_v30  ;;  %v1350_v40 = vadd.f32 %v3663_v34, %v1164_v55  ;;  %v1710_v50 = vadd.f32 %v3705_v24, %v1530_v38 }
 0x14b   : > { %3921 = vst [vmem:[#allocation19_spill] sm:$0xff] %v3745_v14  ;;  %v3748_v31 = vpop.f32.mrf.mxu1  ;;  %v1161_v14 = vadd.f32 %v3661_v27, %v3624_v5  ;;  %v1527_v56 = vadd.f32 %v1456_v21, %v1345_v44  ;;  %v1163_v27 = vadd.f32 %v3669_v54, %v3628_v53  ;;  %v1167_v30 = vadd.f32 %v3685_v47, %v3636_v3  ;;  %v3922_v3 = vld [vmem:[#allocation15_spill] sm:$0xff] }
 0x14c   : > { %v3752_v19 = vpop.f32.mrf.mxu0  ;;  %v1354_v55 = vadd.f32 %v3679_v9, %v1168_v58 }
 0x14d   : > { %v3754_v59 = vpop.f32.mrf.mxu1  ;;  %v1347_v5 = vadd.f32 %v3659_v41, %v1161_v14  ;;  %v1166_v41 = vadd.f32 %v3673_v7, %v3630_v23  ;;  %v1707_v54 = vadd.f32 %v3703_v25, %v1527_v56  ;;  %v1349_v21 = vadd.f32 %v3667_v32, %v1163_v27  ;;  %v3923_v56 = vld [vmem:[#allocation5_spill] sm:$0xff] }
 0x14e   : > { %v3759_v60 = vpop.f32.mrf.mxu0  ;;  %v1532_v23 = vadd.f32 %v3713_v49, %v1350_v40  ;;  %v3929_v40 = vld [vmem:[#allocation10_spill] sm:$0xff] }
 0x14f   : > { %v3763_v46 = vpop.f32.mrf.mxu1  ;;  %v1529_v14 = vadd.f32 %v3709_v63, %v1347_v5  ;;  %v1352_v17 = vadd.f32 %v3671_v8, %v1166_v41  ;;  %v1531_v33 = vadd.f32 %v3717_v39, %v1349_v21  ;;  %v3925_v5 = vld [vmem:[#allocation8_spill] sm:$0xff] }
 0x150   : > { %v2761_v45 = vpop.f32.mrf.mxu0 }
 0x151   : > { %v2735_v29 = vpop.f32.mrf.mxu1  ;;  %v1709_v44 = vadd.f32 %v3707_v57, %v1529_v14  ;;  %v1534_v16 = vadd.f32 %v3721_v20, %v1352_v17  ;;  %v1711_v62 = vadd.f32 %v3715_v26, %v1531_v33 }
 0x152   : > { %v1892_v37 = vadd.f32 %v2735_v29, %v1706_v0  ;;  %v1994_v61 = vpop.f32.mrf.mxu0  ;;  %v1351_v0 = vadd.f32 %v3675_v2, %v1165_v1  ;;  %v1170_v29 = vadd.f32 %v3689_v52, %v3638_v42  ;;  %v1536_v42 = vadd.f32 %v3730_v28, %v1354_v55  ;;  %v3932_v1 = vld [vmem:[#allocation7_spill] sm:$0xff] }
 0x153   : > { %v1812_v36 = vpop.f32.mrf.mxu1 }
 0x154   : > { %v2074_v6 = vadd.f32 %v2761_v45, %v1892_v37  ;;  %v1891_v48 = vadd.f32 %v1812_v36, %v1705_v43  ;;  %v2764_v18 = vpop.f32.mrf.mxu0  ;;  %v1712_v45 = vadd.f32 %v3711_v22, %v1532_v23  ;;  %v1533_v47 = vadd.f32 %v3922_v3, %v1351_v0  ;;  %v3926_v36 = vld [vmem:[#allocation13_spill] sm:$0xff]  ;;  %v3934_v23 = vld [vmem:[#allocation12_spill] sm:$0xff] }
 0x155   : > { %v2738_v53 = vpop.f32.mrf.mxu1  ;;  %v1353_v37 = vadd.f32 %v3923_v56, %v1167_v30  ;;  %v3937_v0 = vld [vmem:[#allocation17_spill] sm:$0xff] }
 0x156   : > { %2091 = vst.msk [vmem:[%s3775_s11 + $0x8] sm:$0xff] %vm2089_vm3, %v2074_v6  ;;  %v2073_v4 = vadd.f32 %v1994_v61, %v1891_v48  ;;  %v1894_v12 = vadd.f32 %v2738_v53, %v1708_v35  ;;  %v2004_v51 = vpop.f32.mrf.mxu0  ;;  %v3924_v61 = vld [vmem:[#allocation3_spill] sm:$0xff]  ;;  %v1714_v35 = vadd.f32 %v3926_v36, %v1534_v16  ;;  %v3927_v6 = vld [vmem:[#allocation6_spill] sm:$0xff] }
 0x157   : > { %v1822_v34 = vpop.f32.mrf.mxu1  ;;  %v1169_v27 = vadd.f32 %v3925_v5, %v3924_v61  ;;  %v1356_v48 = vadd.f32 %v3927_v6, %v1170_v29 }
 0x158   : > { %2090 = vst.msk [vmem:[%s3775_s11] sm:$0xff] %vm2089_vm3, %v2073_v4  ;;  %v2076_v7 = vadd.f32 %v2764_v18, %v1894_v12  ;;  %v1893_v25 = vadd.f32 %v1822_v34, %v1707_v54  ;;  %v2767_v63 = vpop.f32.mrf.mxu0  ;;  %v3928_v18 = vld [vmem:[#allocation2_spill] sm:$0xff] }
 0x159   : > { %v2741_v32 = vpop.f32.mrf.mxu1  ;;  %v1172_v41 = vadd.f32 %v3929_v40, %v3928_v18  ;;  %v3930_v54 = vld [vmem:[#allocation14_spill] sm:$0xff]  ;;  %v1355_v34 = vadd.f32 %v3932_v1, %v1169_v27  ;;  %v1538_v58 = vadd.f32 %v3741_v10, %v1356_v48  ;;  %v3938_v10 = vld [vmem:[#allocation11_spill] sm:$0xff] }
 0x15a   : > { %2093 = vst.msk [vmem:[%s3775_s11 + $0x18] sm:$0xff] %vm2089_vm3, %v2076_v7  ;;  %v2075_v15 = vadd.f32 %v2004_v51, %v1893_v25  ;;  %v1896_v24 = vadd.f32 %v2741_v32, %v1710_v50  ;;  %v2014_v49 = vpop.f32.mrf.mxu0  ;;  %v1713_v14 = vadd.f32 %v3930_v54, %v1533_v47  ;;  %v3931_v4 = vld [vmem:[#allocation18_spill] sm:$0xff]  ;;  %v3933_v50 = vld [vmem:[#allocation4_spill] sm:$0xff]  ;;  %v3939_v47 = vld [vmem:[#allocation19_spill] sm:$0xff] }
 0x15b   : > { %v1832_v8 = vpop.f32.mrf.mxu1  ;;  %v1535_v12 = vadd.f32 %v3931_v4, %v1353_v37  ;;  %v1171_v7 = vadd.f32 %v3934_v23, %v3933_v50  ;;  %v1718_v55 = vadd.f32 %v3739_v13, %v1538_v58 }
 0x15c   : > { %2092 = vst.msk [vmem:[%s3775_s11 + $0x10] sm:$0xff] %vm2089_vm3, %v2075_v15  ;;  %v2078_v11 = vadd.f32 %v2767_v63, %v1896_v24  ;;  %v1895_v57 = vadd.f32 %v1832_v8, %v1709_v44  ;;  %v2770_v39 = vpop.f32.mrf.mxu0  ;;  %v3935_v63 = vld [vmem:[#allocation16_spill] sm:$0xff]  ;;  %v3936_v15 = vld [vmem:[#allocation9_spill] sm:$0xff]  ;;  %v1537_v8 = vadd.f32 %v3748_v31, %v1355_v34 }
 0x15d   : > { %v2744_v2 = vpop.f32.mrf.mxu1  ;;  %v1716_v17 = vadd.f32 %v3935_v63, %v1536_v42  ;;  %v1358_v24 = vadd.f32 %v3936_v15, %v1172_v41  ;;  %v1715_v30 = vadd.f32 %v3937_v0, %v1535_v12 }
 0x15e   : > { %2095 = vst.msk [vmem:[%s3775_s11 + $0x28] sm:$0xff] %vm2089_vm3, %v2078_v11  ;;  %v2077_v22 = vadd.f32 %v2014_v49, %v1895_v57  ;;  %v1898_v20 = vadd.f32 %v2744_v2, %v1712_v45  ;;  %v2024_v43 = vpop.f32.mrf.mxu0  ;;  %v1357_v57 = vadd.f32 %v3938_v10, %v1171_v7 }
 0x15f   : > { %v1842_v9 = vpop.f32.mrf.mxu1  ;;  %v1540_v29 = vadd.f32 %v3754_v59, %v1358_v24 }
 0x160   : > { %2094 = vst.msk [vmem:[%s3775_s11 + $0x20] sm:$0xff] %vm2089_vm3, %v2077_v22  ;;  %v2080_v52 = vadd.f32 %v2770_v39, %v1898_v20  ;;  %v1897_v26 = vadd.f32 %v1842_v9, %v1711_v62  ;;  %v2773_v38 = vpop.f32.mrf.mxu0  ;;  %v1717_v22 = vadd.f32 %v3939_v47, %v1537_v8  ;;  %v1539_v20 = vadd.f32 %v3763_v46, %v1357_v57 }
 0x161   : > { %v2747_v53 = vpop.f32.mrf.mxu1  ;;  %v1720_v59 = vadd.f32 %v3752_v19, %v1540_v29 }
 0x162   : > { %2097 = vst.msk [vmem:[%s3775_s11 + $0x38] sm:$0xff] %vm2089_vm3, %v2080_v52  ;;  %v2079_v51 = vadd.f32 %v2024_v43, %v1897_v26  ;;  %v1900_v28 = vadd.f32 %v2747_v53, %v1714_v35  ;;  %v2034_v21 = vpop.f32.mrf.mxu0  ;;  %v1719_v36 = vadd.f32 %v3759_v60, %v1539_v20 }
 0x163   : > { %v1852_v25 = vpop.f32.mrf.mxu1 }
 0x164   : > { %2096 = vst.msk [vmem:[%s3775_s11 + $0x30] sm:$0xff] %vm2089_vm3, %v2079_v51  ;;  %v2082_v32 = vadd.f32 %v2773_v38, %v1900_v28  ;;  %v1899_v44 = vadd.f32 %v1852_v25, %v1713_v14  ;;  %v2776_v33 = vpop.f32.mrf.mxu0 }
 0x165   : > { %v2750_v49 = vpop.f32.mrf.mxu1 }
 0x166   : > { %2099 = vst.msk [vmem:[%s3775_s11 + $0x48] sm:$0xff] %vm2089_vm3, %v2082_v32  ;;  %v2081_v45 = vadd.f32 %v2034_v21, %v1899_v44  ;;  %v1902_v16 = vadd.f32 %v2750_v49, %v1716_v17  ;;  %v2044_v11 = vpop.f32.mrf.mxu0 }
 0x167   : > { %v1862_v39 = vpop.f32.mrf.mxu1 }
 0x168   : > { %2098 = vst.msk [vmem:[%s3775_s11 + $0x40] sm:$0xff] %vm2089_vm3, %v2081_v45  ;;  %v2084_v2 = vadd.f32 %v2776_v33, %v1902_v16  ;;  %v1901_v62 = vadd.f32 %v1862_v39, %v1715_v30  ;;  %v2779_v3 = vpop.f32.mrf.mxu0 }
 0x169   : > { %v2753_v31 = vpop.f32.mrf.mxu1 }
 0x16a   : > { %2101 = vst.msk [vmem:[%s3775_s11 + $0x58] sm:$0xff] %vm2089_vm3, %v2084_v2  ;;  %v2083_v43 = vadd.f32 %v2044_v11, %v1901_v62  ;;  %v1904_v56 = vadd.f32 %v2753_v31, %v1718_v55  ;;  %v2054_v37 = vpop.f32.mrf.mxu0 }
 0x16b   : > { %v1872_v13 = vpop.f32.mrf.mxu1 }
 0x16c   : > { %2100 = vst.msk [vmem:[%s3775_s11 + $0x50] sm:$0xff] %vm2089_vm3, %v2083_v43  ;;  %v2086_v61 = vadd.f32 %v2779_v3, %v1904_v56  ;;  %v1903_v5 = vadd.f32 %v1872_v13, %v1717_v22  ;;  %v2782_v9 = vpop.f32.mrf.mxu0 }
 0x16d   : > { %v2756_v27 = vpop.f32.mrf.mxu1 }
 0x16e   : > { %2103 = vst.msk [vmem:[%s3775_s11 + $0x68] sm:$0xff] %vm2089_vm3, %v2086_v61  ;;  %v2085_v46 = vadd.f32 %v2054_v37, %v1903_v5  ;;  %v1906_v35 = vadd.f32 %v2756_v27, %v1720_v59  ;;  %v2064_v38 = vpop.f32.mrf.mxu0 }
 0x16f   : > { %v1882_v42 = vpop.f32.mrf.mxu1 }
 0x170   : > { %2102 = vst.msk [vmem:[%s3775_s11 + $0x60] sm:$0xff] %vm2089_vm3, %v2085_v46  ;;  %v2088_v52 = vadd.f32 %v2782_v9, %v1906_v35  ;;  %v1905_v26 = vadd.f32 %v1882_v42, %v1719_v36 }
 0x172   : > { %2105 = vst.msk [vmem:[%s3775_s11 + $0x78] sm:$0xff] %vm2089_vm3, %v2088_v52  ;;  %v2087_v19 = vadd.f32 %v2064_v38, %v1905_v26 }
 0x174   : > { %2104 = vst.msk [vmem:[%s3775_s11 + $0x70] sm:$0xff] %vm2089_vm3, %v2087_v19 }
 0x175 PF: > { %s13_s16 = sadd.s32 1, %s2866_s16   ;;  %s3940_s12 = smov %s2858_s14 }
 0x176   : > { %p10_p9 = scmp.ge.s32.totalorder %s13_s16, 6   ;;  %s3941_s13 = smov %s2862_s15 }
 0x177   : > { %s3942_s14 = smov %s3945_s17  ;;  %s3943_s15 = smov %s3949_s18 }
 0x178   :  { %12 = sbr.rel (!%p10_p9) target bundleno = 3 (0x3), region = 65 }

</bundles_post_ra>
